<compile_context>
chip_gen: v6e
topology: v6e:2x2x1
jax: 0.10.0
libtpu: 0.0.40
codegen_flags: <defaults>
</compile_context>

<pallas_src>
import jax
import jax.numpy as jnp
import numpy as np
from jax.experimental import pallas as pl
from jax.experimental.pallas import tpu as pltpu


# ---------------------------------------------------------------------------
# Helpers
# ---------------------------------------------------------------------------
def _round_up(x, m):
    return (x + m - 1) // m * m


def _pad2(a, rows, cols):
    return jnp.pad(a, ((0, rows - a.shape[0]), (0, cols - a.shape[1])))


def _vmem_capacity_bytes():
    try:
        info = pltpu.get_tpu_info()
        cap = getattr(info, "vmem_capacity_bytes", None)
        if cap:
            return int(cap)
    except Exception:
        pass
    return 64 * 1024 * 1024          # conservative default (v7x per-TC VMEM)


def _init_tile(n_pad):
    """Largest node tile (<=1024) that divides n_pad (n_pad is a multiple of 128)."""
    for t in (1024, 512, 256, 128):
        if n_pad % t == 0:
            return t
    return n_pad


def _choose_layer_tiles(n, d_pad, h_itemsize, vmem_cap, tk_cap=2048):
    """Pick (tn, tk, n_pad) for the aggregation layer.

    tn: destination-node tile (128 or 256; keep >=2 dst tiles so v7x megacore has work).
    tk: source-node chunk -- multiple of tn, divides n_pad, sized from a VMEM budget.
    """
    tn = 256
    if _round_up(n, tn) // tn < 2:
        tn = 128
    n_pad = _round_up(n, tn)
    n_tiles = n_pad // tn

    budget = int(vmem_cap * 0.6)
    fixed = (2 * 2 * tn * d_pad * h_itemsize        # h_self + out blocks, double-buffered
             + 2 * 3 * d_pad * d_pad * h_itemsize   # 3 fused weight mats, double-buffered
             + 2 * tn * d_pad * 4                   # 2 f32 accumulators (scratch)
             + 2 * 2 * 2 * tn * 128 * 4)            # 1/deg blocks (lane-padded), double-buffered
    per_tk = 2 * 2 * tn * 1 + 2 * d_pad * h_itemsize  # two int8 A blocks + h_src chunk, dbl-buf
    tk_budget = max(tn, (budget - fixed) // max(per_tk, 1))
    tk_budget = min(tk_budget, tk_cap)

    best = 1
    for f in range(1, n_tiles + 1):
        if n_tiles % f == 0 and tn * f <= tk_budget:
            best = f
    tk = tn * best
    return tn, tk, n_pad


def _fused_layer_weights(lp, d_pad):
    """Fold each direction's fc_neigh into fc_self_neigh (host-side, f32 HIGHEST):
       concat([h, (A@h)@Wnf, (A'@h)@Wnb],1) @ [Ws_self; Ws_f; Ws_b]
    == h@Ws_self + (A@h)@(Wnf@Ws_f) + (A'@h)@(Wnb@Ws_b)."""
    hp = jax.lax.Precision.HIGHEST
    w_f = jnp.dot(lp["wnf"], lp["ws_f"], precision=hp)
    w_b = jnp.dot(lp["wnb"], lp["ws_b"], precision=hp)
    return (_pad2(lp["ws_self"], d_pad, d_pad),
            _pad2(w_f, d_pad, d_pad),
            _pad2(w_b, d_pad, d_pad))


# ---------------------------------------------------------------------------
# Kernels
# ---------------------------------------------------------------------------
def _init_layer_kernel(x_ref, w0_ref, out_ref):
    """h = relu(x @ W0) for one lane-dense tile of node rows."""
    acc = jnp.dot(x_ref[...], w0_ref[...], preferred_element_type=jnp.float32)
    out_ref[...] = jnp.maximum(acc, 0.0).astype(out_ref.dtype)


def _dir_pcapass_layer_kernel(a_f_ref, a_b_ref, h_src_ref, h_self_ref,
                              dinv_f_ref, dinv_b_ref,
                              w_self_ref, w_f_ref, w_b_ref,
                              out_ref, acc_f_ref, acc_b_ref):
    """One DirPCAPassConv layer, K-tiled over source-node chunks.

    grid = (dst node tiles [parallel], src node chunks [arbitrary, last])
    a_f/a_b     : (tn, tk) int8 {0,1} adjacency blocks (unnormalized; dst tile i, src chunk k)
    h_src       : (tk, D)  source-chunk features (compute dtype)
    h_self      : (tn, D)  destination-tile features
    dinv_f/b    : (tn, 1)  f32 per-destination 1/in-degree (mean normalisation)
    w_self/f/b  : (D, D)   fused weights [Ws_self, Wnf@Ws_f, Wnb@Ws_b]
    acc_f/acc_b : (tn, D)  f32 VMEM accumulators for A01@H per direction
    """
    k = pl.program_id(1)

    @pl.when(k == 0)
    def _():
        acc_f_ref[...] = jnp.zeros_like(acc_f_ref)
        acc_b_ref[...] = jnp.zeros_like(acc_b_ref)

    cd = h_src_ref.dtype
    h_src = h_src_ref[...]
    # int8 -> compute dtype cast is a cheap VPU op hidden under the adjacency DMA.
    a_f = a_f_ref[...].astype(jnp.float32).astype(cd)
    a_b = a_b_ref[...].astype(jnp.float32).astype(cd)
    acc_f_ref[...] += jnp.dot(a_f, h_src, preferred_element_type=jnp.float32)
    acc_b_ref[...] += jnp.dot(a_b, h_src, preferred_element_type=jnp.float32)

    @pl.when(k == pl.num_programs(1) - 1)
    def _():
        # Mean aggregation: scale the summed neighbors by 1/deg (exact split of A/deg @ h).
        neigh_f = (acc_f_ref[...] * dinv_f_ref[...]).astype(cd)
        neigh_b = (acc_b_ref[...] * dinv_b_ref[...]).astype(cd)
        # No lane-axis concat: three accumulated dots against the fused weight blocks.
        rst = jnp.dot(h_self_ref[...], w_self_ref[...], preferred_element_type=jnp.float32)
        rst = rst + jnp.dot(neigh_f, w_f_ref[...], preferred_element_type=jnp.float32)
        rst = rst + jnp.dot(neigh_b, w_b_ref[...], preferred_element_type=jnp.float32)
        out_ref[...] = jnp.maximum(rst, 0.0).astype(out_ref.dtype)   # activation = relu


# ---------------------------------------------------------------------------
# pallas_call wrappers
# ---------------------------------------------------------------------------
def _init_layer_call(x_p, w0_p, *, vmem_limit):
    n_pad, f_pad = x_p.shape
    d_pad = w0_p.shape[1]
    tn = _init_tile(n_pad)
    return pl.pallas_call(
        _init_layer_kernel,
        out_shape=jax.ShapeDtypeStruct((n_pad, d_pad), x_p.dtype),
        grid_spec=pltpu.PrefetchScalarGridSpec(
            num_scalar_prefetch=0,
            grid=(n_pad // tn,),
            in_specs=[pl.BlockSpec((tn, f_pad), lambda i: (i, 0)),
                      pl.BlockSpec((f_pad, d_pad), lambda i: (0, 0))],
            out_specs=pl.BlockSpec((tn, d_pad), lambda i: (i, 0)),
        ),
        compiler_params=pltpu.CompilerParams(
            dimension_semantics=("parallel",),
            vmem_limit_bytes=vmem_limit),
    )(x_p, w0_p)


def _dir_pcapass_layer_call(a01_f, a01_b, dinv_f, dinv_b, h,
                            w_self, w_f, w_b, *, tn, tk, vmem_limit):
    n_pad, d_pad = h.shape
    assert tn % 128 == 0 and tk % tn == 0
    assert n_pad % tn == 0 and n_pad % tk == 0
    return pl.pallas_call(
        _dir_pcapass_layer_kernel,
        out_shape=jax.ShapeDtypeStruct((n_pad, d_pad), h.dtype),
        grid_spec=pltpu.PrefetchScalarGridSpec(
            num_scalar_prefetch=0,
            grid=(n_pad // tn, n_pad // tk),
            in_specs=[
                pl.BlockSpec((tn, tk), lambda i, k: (i, k)),        # A01 fwd block (int8)
                pl.BlockSpec((tn, tk), lambda i, k: (i, k)),        # A01 bwd block (int8)
                pl.BlockSpec((tk, d_pad), lambda i, k: (k, 0)),     # H source chunk
                pl.BlockSpec((tn, d_pad), lambda i, k: (i, 0)),     # H self tile
                pl.BlockSpec((tn, 1), lambda i, k: (i, 0)),         # 1/deg fwd
                pl.BlockSpec((tn, 1), lambda i, k: (i, 0)),         # 1/deg bwd
                pl.BlockSpec((d_pad, d_pad), lambda i, k: (0, 0)),  # W_self
                pl.BlockSpec((d_pad, d_pad), lambda i, k: (0, 0)),  # W_f fused
                pl.BlockSpec((d_pad, d_pad), lambda i, k: (0, 0)),  # W_b fused
            ],
            out_specs=pl.BlockSpec((tn, d_pad), lambda i, k: (i, 0)),
            scratch_shapes=[pltpu.VMEM((tn, d_pad), jnp.float32),
                            pltpu.VMEM((tn, d_pad), jnp.float32)],
        ),
        compiler_params=pltpu.CompilerParams(
            dimension_semantics=("parallel", "arbitrary"),
            vmem_limit_bytes=vmem_limit),
    )(a01_f, a01_b, h, h, dinv_f, dinv_b, w_self, w_f, w_b)


def pcapass_graphsage_forward(x, adj, params, *, compute_dtype=jnp.bfloat16, tk_cap=2048):
    """Full PCAPassGraphSAGE (directed) forward.

    adj is the dense {0,1} adjacency with adj[dst, src] = 1 for edge src->dst.
    Node count is zero-padded to a tile multiple and feature dims to multiples of 128;
    padding is sliced off at the end. Zero padding is exact for this model (relu(0)=0,
    zero adjacency rows/cols, zero weight rows/cols)."""
    n, f_in = x.shape
    assert adj.shape == (n, n)
    d = params["w0"].shape[1]
    f_pad = _round_up(f_in, 128)
    d_pad = _round_up(d, 128)
    cd = compute_dtype
    h_itemsize = jnp.dtype(cd).itemsize

    vmem_cap = _vmem_capacity_bytes()
    vmem_limit = min(int(vmem_cap * 0.7), 96 * 1024 * 1024)
    tn, tk, n_pad = _choose_layer_tiles(n, d_pad, h_itemsize, vmem_cap, tk_cap=tk_cap)

    # Exact {0,1} int8 adjacency (halved HBM stream) + f32 per-dst mean normalisation.
    adj_p = _pad2(adj, n_pad, n_pad)
    adj_pt = adj_p.T                                        # graph.reverse()
    a01_f = adj_p.astype(jnp.int8)
    a01_b = adj_pt.astype(jnp.int8)
    dinv_f = (1.0 / jnp.maximum(adj_p.sum(axis=1, keepdims=True), 1.0)).astype(jnp.float32)
    dinv_b = (1.0 / jnp.maximum(adj_pt.sum(axis=1, keepdims=True), 1.0)).astype(jnp.float32)

    x_p = _pad2(x, n_pad, f_pad).astype(cd)
    w0_p = _pad2(params["w0"], f_pad, d_pad).astype(cd)

    h = _init_layer_call(x_p, w0_p, vmem_limit=vmem_limit)           # (n_pad, d_pad)
    for lp in params["layers"]:
        w_self, w_f, w_b = (w.astype(cd) for w in _fused_layer_weights(lp, d_pad))
        h = _dir_pcapass_layer_call(a01_f, a01_b, dinv_f, dinv_b, h,
                                    w_self, w_f, w_b,
                                    tn=tn, tk=tk, vmem_limit=vmem_limit)
    return h[:n, :d]


# ---------------------------------------------------------------------------
# References
# ---------------------------------------------------------------------------
def reference_forward_module(x, adj, params):
    """Pure float32 mirror of the PyTorch module (unfused, eval mode)."""
    hp = jax.lax.Precision.HIGHEST
    deg_in = jnp.maximum(adj.sum(axis=1, keepdims=True), 1.0)
    a_fwd = adj / deg_in
    adj_rev = adj.T
    deg_rev = jnp.maximum(adj_rev.sum(axis=1, keepdims=True), 1.0)
    a_bwd = adj_rev / deg_rev
    h = jnp.maximum(jnp.dot(x, params["w0"], precision=hp), 0.0)
    for lp in params["layers"]:
        neigh_f = jnp.dot(jnp.dot(a_fwd, h, precision=hp), lp["wnf"], precision=hp)
        neigh_b = jnp.dot(jnp.dot(a_bwd, h, precision=hp), lp["wnb"], precision=hp)
        w_sn = jnp.concatenate([lp["ws_self"], lp["ws_f"], lp["ws_b"]], axis=0)
        z = jnp.concatenate([h, neigh_f, neigh_b], axis=1)
        h = jnp.maximum(jnp.dot(z, w_sn, precision=hp), 0.0)
    return h


def reference_forward_matched(x, adj, params, compute_dtype):
    """Same math as the kernel at the same precision (int8 {0,1} adjacency, post-scale
    by 1/deg, fused weights, low-precision operands, f32 accumulation)."""
    cd = compute_dtype
    f32 = jnp.float32
    hp = jax.lax.Precision.HIGHEST
    adj_t = adj.T
    a01_f = adj.astype(jnp.int8).astype(f32).astype(cd)
    a01_b = adj_t.astype(jnp.int8).astype(f32).astype(cd)
    dinv_f = (1.0 / jnp.maximum(adj.sum(axis=1, keepdims=True), 1.0)).astype(f32)
    dinv_b = (1.0 / jnp.maximum(adj_t.sum(axis=1, keepdims=True), 1.0)).astype(f32)

    h = jnp.maximum(jnp.dot(x.astype(cd), params["w0"].astype(cd),
                            preferred_element_type=f32), 0.0).astype(cd)
    for lp in params["layers"]:
        w_self = lp["ws_self"].astype(cd)
        w_f = jnp.dot(lp["wnf"], lp["ws_f"], precision=hp).astype(cd)
        w_b = jnp.dot(lp["wnb"], lp["ws_b"], precision=hp).astype(cd)
        acc_f = jnp.dot(a01_f, h, preferred_element_type=f32)
        acc_b = jnp.dot(a01_b, h, preferred_element_type=f32)
        neigh_f = (acc_f * dinv_f).astype(cd)
        neigh_b = (acc_b * dinv_b).astype(cd)
        rst = (jnp.dot(h, w_self, preferred_element_type=f32)
               + jnp.dot(neigh_f, w_f, preferred_element_type=f32)
               + jnp.dot(neigh_b, w_b, preferred_element_type=f32))
        h = jnp.maximum(rst, 0.0).astype(cd)
    return h


# ---------------------------------------------------------------------------
# Main
# ---------------------------------------------------------------------------
if __name__ == "__main__":
    N = 200           # number of graph nodes (deliberately not a tile multiple)
    IN_DIM = 48       # raw input feature dim (padded to 128 internally)
    HIDDEN = 128      # hidden_dim (lane-dense)
    NUM_LAYERS = 2    # num_layers

    key = jax.random.PRNGKey(0)
    keys = jax.random.split(key, 3 + 5 * NUM_LAYERS)

    # Node features.
    x = jax.random.normal(keys[0], (N, IN_DIM), dtype=jnp.float32)

    # Random directed graph -> dense {0,1} adjacency, adj[dst, src] = 1 for edge src->dst.
    adj = (jax.random.uniform(keys[1], (N, N)) < 0.1).astype(jnp.float32)
    adj = adj * (1.0 - jnp.eye(N, dtype=jnp.float32))

    # Deterministic parameter init (Linear weights stored as (in, out)).
    def winit(k, fan_in, fan_out):
        return (jax.random.normal(k, (fan_in, fan_out), dtype=jnp.float32)
                / jnp.sqrt(jnp.float32(fan_in)))

    params = {"w0": winit(keys[2], IN_DIM, HIDDEN), "layers": []}
    kidx = 3
    for _ in range(NUM_LAYERS):
        params["layers"].append({
            "wnf": winit(keys[kidx + 0], HIDDEN, HIDDEN),      # fwd OneDirSAGEConv.fc_neigh
            "wnb": winit(keys[kidx + 1], HIDDEN, HIDDEN),      # bwd OneDirSAGEConv.fc_neigh
            "ws_self": winit(keys[kidx + 2], HIDDEN, HIDDEN),  # fc_self_neigh rows [0:H)
            "ws_f": winit(keys[kidx + 3], HIDDEN, HIDDEN),     # fc_self_neigh rows [H:2H)
            "ws_b": winit(keys[kidx + 4], HIDDEN, HIDDEN),     # fc_self_neigh rows [2H:3H)
        })
        kidx += 5

    # 1) float32 kernel run vs. the unfused module-semantics reference.
    out_f32 = jax.block_until_ready(
        pcapass_graphsage_forward(x, adj, params, compute_dtype=jnp.float32))
    ref_f32 = reference_forward_module(x, adj, params)
    np.testing.assert_allclose(np.asarray(out_f32), np.asarray(ref_f32),
                               rtol=1e-2, atol=1e-2)

    # 2) bf16 kernel run (performance configuration) vs. a precision-matched reference.
    out_bf16 = jax.block_until_ready(
        pcapass_graphsage_forward(x, adj, params, compute_dtype=jnp.bfloat16))
    ref_bf16 = reference_forward_matched(x, adj, params, jnp.bfloat16)
    np.testing.assert_allclose(np.asarray(out_bf16, dtype=np.float32),
                               np.asarray(ref_bf16, dtype=np.float32),
                               rtol=2e-2, atol=2e-2)

    print("KERNEL_OK")
</pallas_src>

<mosaic_0001>
module attributes {stable_mosaic.version = 11 : i64} {
  func.func @_init_layer_kernel(%arg0: i32, %arg1: memref<256x128xf32, #tpu.memory_space<vmem>>, %arg2: memref<128x128xf32, #tpu.memory_space<vmem>>, %arg3: memref<256x128xf32, #tpu.memory_space<vmem>>) attributes {dimension_semantics = [#tpu.dimension_semantics<parallel>], iteration_bounds = array<i64: 1>, scalar_prefetch = 0 : i64, scratch_operands = 0 : i64, tpu.core_type = #tpu.core_type<tc>, window_params = [{transform_indices = @transform_0, window_bounds = array<i64: 256, 128>}, {pipeline_mode = #tpu.pipeline_mode<synchronous>, transform_indices = @transform_1, window_bounds = array<i64: 128, 128>}, {transform_indices = @transform_2, window_bounds = array<i64: 256, 128>}]} {
    %c0 = arith.constant 0 : index
    %c0_0 = arith.constant 0 : index
    %0 = vector.load %arg1[%c0, %c0_0] : memref<256x128xf32, #tpu.memory_space<vmem>>, vector<256x128xf32>
    %c0_1 = arith.constant 0 : index
    %c0_2 = arith.constant 0 : index
    %1 = vector.load %arg2[%c0_1, %c0_2] : memref<128x128xf32, #tpu.memory_space<vmem>>, vector<128x128xf32>
    %cst = arith.constant dense<0.000000e+00> : vector<256x128xf32>
    %2 = tpu.matmul %0, %1, %cst {dimension_numbers = #tpu.dot_dimension_numbers<[1], [0], [0], [1], [0, 0, 1, 1], [], []>} : vector<256x128xf32>, vector<128x128xf32>, vector<256x128xf32> -> vector<256x128xf32>
    %cst_3 = arith.constant 0.000000e+00 : f32
    %3 = vector.broadcast %cst_3 : f32 to vector<256x128xf32>
    %4 = arith.maximumf %2, %3 : vector<256x128xf32>
    %c0_4 = arith.constant 0 : index
    %c0_5 = arith.constant 0 : index
    %5 = vector.load %arg3[%c0_4, %c0_5] : memref<256x128xf32, #tpu.memory_space<vmem>>, vector<256x128xf32>
    tpu.vector_store %arg3[%c0_4, %c0_5], %4 {strides = array<i32>} : memref<256x128xf32, #tpu.memory_space<vmem>>, vector<256x128xf32>,
    return
  }
  func.func @transform_0(%arg0: i32) -> (i32, i32) {
    %c0_i32 = arith.constant 0 : i32
    %c0_i32_0 = arith.constant 0 : i32
    return %arg0, %c0_i32 : i32, i32
  }
  func.func @transform_1(%arg0: i32) -> (i32, i32) {
    %c0_i32 = arith.constant 0 : i32
    %c0_i32_0 = arith.constant 0 : i32
    %c0_i32_1 = arith.constant 0 : i32
    return %c0_i32, %c0_i32_0 : i32, i32
  }
  func.func @transform_2(%arg0: i32) -> (i32, i32) {
    %c0_i32 = arith.constant 0 : i32
    %c0_i32_0 = arith.constant 0 : i32
    return %arg0, %c0_i32 : i32, i32
  }
}

</mosaic_0001>

<bundles_post_ra>
// kernel: tpu_custom_call.1
= control target key start
LH: loop header
LB: loop body
LE: loop exit
PB: predicated region body
PF: predicated region fallthrough
CT: control target
= control target key end

     0   :  { %7 = vsyncpa [#allocation3], 0  ;;  %s664_s0 = inlined_call_operand.hbm [shape: f32[256,128], index: 0, kind: input, shape index: {}]   ;;  %s665_s1 = inlined_call_operand.hbm [shape: f32[128,128], index: 1, kind: input, shape index: {}]   ;;  %s666_s2 = inlined_call_operand.hbm [shape: f32[256,128], index: 2, kind: output, shape index: {}]  }
   0x1   :  { %8 = vsyncpa [#allocation6], 0 }
   0x2   :  { %9 = vsyncpa [#allocation4], 0  ;;  %s626_s9 = smov [#allocation2]  }
   0x3   :  { %s15_s10 = sshll.u32 %s626_s9, 4  ;;  %s16_s10 = int_to_ptr.vmem [resolvable:$true] %s15_s10 }
   0x4   :  { %s568_s11 = scalar_lea.vmem %s16_s10, 4096  ;;  %p573_p1 = scmp.lt.s32.totalorder %s16_s10, %s16_s10 }
   0x5   :  { %p569_p0 = scmp.ne.s32.totalorder %s16_s10, %s568_s11  ;;  %p574_p2 = scmp.lt.s32.totalorder %s568_s11, %s568_s11 }
   0x7   :  { %p575_p3 = por %p574_p2, %p573_p1 }
   0x9   :  { %p576_p4 = pnand %p575_p3, %p569_p0 }
   0xb   :  { %579 = shalt.err (!%p576_p4)
}
   0xc   :  { %s627_s12 = smov 128   ;;  %s628_s13 = smov 8  }
   0xd   :  { %21 = dma.hbm_to_vmem [thread:$0]  %s664_s0, 4096, %s16_s10, [#allocation3], %s627_s12, %s627_s12, %s628_s13  }
   0xe   :  { %s629_s16 = smov [#allocation5]  }
   0xf   :  { %s27_s17 = sshll.u32 %s629_s16, 4  ;;  %s28_s17 = int_to_ptr.vmem [resolvable:$true] %s27_s17 }
  0x10   :  { %s588_s18 = scalar_lea.vmem %s28_s17, 2048  ;;  %p593_p6 = scmp.lt.s32.totalorder %s28_s17, %s28_s17 }
  0x11   :  { %p589_p5 = scmp.ne.s32.totalorder %s28_s17, %s588_s18  ;;  %p594_p7 = scmp.lt.s32.totalorder %s588_s18, %s588_s18 }
  0x13   :  { %p595_p8 = por %p594_p7, %p593_p6 }
  0x15   :  { %p596_p9 = pnand %p595_p8, %p589_p5 }
  0x17   :  { %599 = shalt.err (!%p596_p9)
}
  0x18   :  { %33 = dma.hbm_to_vmem [thread:$0]  %s665_s1, 2048, %s28_s17, [#allocation6], %s627_s12, %s627_s12, %s628_s13  }
  0x19   :  { %620 = dma.done.wait [#allocation3], 4096  }
  0x1a   :  { %621 = vsyncadd [#allocation3], 4294963200 }
  0x1b   :  { %622 = dma.done.wait [#allocation6], 2048  }
  0x1c   :  { %623 = vsyncadd [#allocation6], 4294965248  ;;  %v87_v0 = vld [vmem:[#allocation5 + $0x78] sm:$0xff]  ;;  %v86_v1 = vld [vmem:[#allocation5 + $0x70] sm:$0xff]  ;;  %s630_s0 = smov [#allocation7]  }
  0x1d   :  { %443 = vmatprep.subr.mxu0 %v87_v0  ;;  %523 = vmatprep.subr.mxu1 %v87_v0  ;;  %v85_v2 = vld [vmem:[#allocation5 + $0x68] sm:$0xff]  ;;  %v84_v3 = vld [vmem:[#allocation5 + $0x60] sm:$0xff]  ;;  %v83_v4 = vld [vmem:[#allocation5 + $0x58] sm:$0xff]  ;;  %s382_s1 = sshll.u32 %s630_s0, 4  ;;  %s383_s1 = int_to_ptr.vmem [resolvable:$true] %s382_s1 }
  0x1e   :  { %444 = vmatpush3.msra.mxu0 %v87_v0  ;;  %539 = vmatpush3.msra.mxu1 %v87_v0  ;;  %v82_v5 = vld [vmem:[#allocation5 + $0x50] sm:$0xff]  ;;  %v81_v6 = vld [vmem:[#allocation5 + $0x48] sm:$0xff]  ;;  %v80_v7 = vld [vmem:[#allocation5 + $0x40] sm:$0xff]  ;;  %s600_s21 = scalar_lea.vmem %s383_s1, 4096  ;;  %p605_p11 = scmp.lt.s32.totalorder %s383_s1, %s383_s1 }
  0x1f   :  { %445 = vmatprep.subr.mxu0 %v86_v1  ;;  %524 = vmatprep.subr.mxu1 %v86_v1  ;;  %v79_v8 = vld [vmem:[#allocation5 + $0x38] sm:$0xff]  ;;  %v78_v9 = vld [vmem:[#allocation5 + $0x30] sm:$0xff]  ;;  %v77_v10 = vld [vmem:[#allocation5 + $0x28] sm:$0xff]  ;;  %p601_p10 = scmp.ne.s32.totalorder %s383_s1, %s600_s21  ;;  %p606_p12 = scmp.lt.s32.totalorder %s600_s21, %s600_s21 }
  0x20   :  { %446 = vmatpush3.msra.mxu0 %v86_v1  ;;  %540 = vmatpush3.msra.mxu1 %v86_v1  ;;  %v76_v11 = vld [vmem:[#allocation5 + $0x20] sm:$0xff]  ;;  %v75_v12 = vld [vmem:[#allocation5 + $0x18] sm:$0xff]  ;;  %v74_v13 = vld [vmem:[#allocation5 + $0x10] sm:$0xff] }
  0x21   :  { %447 = vmatprep.subr.mxu0 %v85_v2  ;;  %525 = vmatprep.subr.mxu1 %v85_v2  ;;  %v73_v14 = vld [vmem:[#allocation5 + $0x8] sm:$0xff]  ;;  %v72_v15 = vld [vmem:[#allocation5] sm:$0xff]  ;;  %v42_v20 = vld [vmem:[#allocation2 + $0x10] sm:$0xff]  ;;  %p607_p13 = por %p606_p12, %p605_p11 }
  0x22   :  { %448 = vmatpush3.msra.mxu0 %v85_v2  ;;  %541 = vmatpush3.msra.mxu1 %v85_v2  ;;  %v40_v16 = vld [vmem:[#allocation2] sm:$0xff]  ;;  %v41_v18 = vld [vmem:[#allocation2 + $0x8] sm:$0xff]  ;;  %v58_v21 = vld [vmem:[#allocation2 + $0x90] sm:$0xff] }
  0x23   :  { %449 = vmatprep.subr.mxu0 %v84_v3  ;;  %526 = vmatprep.subr.mxu1 %v84_v3  ;;  %v56_v17 = vld [vmem:[#allocation2 + $0x80] sm:$0xff]  ;;  %v57_v19 = vld [vmem:[#allocation2 + $0x88] sm:$0xff]  ;;  %v43_v22 = vld [vmem:[#allocation2 + $0x18] sm:$0xff]  ;;  %p608_p0 = pnand %p607_p13, %p601_p10 }
  0x24   :  { %450 = vmatpush3.msra.mxu0 %v84_v3  ;;  %542 = vmatpush3.msra.mxu1 %v84_v3  ;;  %v59_v23 = vld [vmem:[#allocation2 + $0x98] sm:$0xff]  ;;  %v44_v24 = vld [vmem:[#allocation2 + $0x20] sm:$0xff]  ;;  %v45_v26 = vld [vmem:[#allocation2 + $0x28] sm:$0xff] }
  0x25   :  { %451 = vmatprep.subr.mxu0 %v83_v4  ;;  %527 = vmatprep.subr.mxu1 %v83_v4  ;;  %v60_v25 = vld [vmem:[#allocation2 + $0xa0] sm:$0xff]  ;;  %v61_v27 = vld [vmem:[#allocation2 + $0xa8] sm:$0xff]  ;;  %v46_v28 = vld [vmem:[#allocation2 + $0x30] sm:$0xff] }
  0x26   :  { %452 = vmatpush3.msra.mxu0 %v83_v4  ;;  %543 = vmatpush3.msra.mxu1 %v83_v4  ;;  %v62_v29 = vld [vmem:[#allocation2 + $0xb0] sm:$0xff]  ;;  %v47_v30 = vld [vmem:[#allocation2 + $0x38] sm:$0xff]  ;;  %v48_v32 = vld [vmem:[#allocation2 + $0x40] sm:$0xff] }
  0x27   :  { %453 = vmatprep.subr.mxu0 %v82_v5  ;;  %528 = vmatprep.subr.mxu1 %v82_v5  ;;  %v63_v31 = vld [vmem:[#allocation2 + $0xb8] sm:$0xff]  ;;  %v64_v33 = vld [vmem:[#allocation2 + $0xc0] sm:$0xff]  ;;  %v49_v34 = vld [vmem:[#allocation2 + $0x48] sm:$0xff] }
  0x28   :  { %454 = vmatpush3.msra.mxu0 %v82_v5  ;;  %544 = vmatpush3.msra.mxu1 %v82_v5  ;;  %v65_v35 = vld [vmem:[#allocation2 + $0xc8] sm:$0xff]  ;;  %v50_v36 = vld [vmem:[#allocation2 + $0x50] sm:$0xff]  ;;  %v51_v38 = vld [vmem:[#allocation2 + $0x58] sm:$0xff] }
  0x29   :  { %455 = vmatprep.subr.mxu0 %v81_v6  ;;  %529 = vmatprep.subr.mxu1 %v81_v6  ;;  %v66_v37 = vld [vmem:[#allocation2 + $0xd0] sm:$0xff]  ;;  %v67_v39 = vld [vmem:[#allocation2 + $0xd8] sm:$0xff]  ;;  %v52_v40 = vld [vmem:[#allocation2 + $0x60] sm:$0xff] }
  0x2a   :  { %456 = vmatpush3.msra.mxu0 %v81_v6  ;;  %545 = vmatpush3.msra.mxu1 %v81_v6  ;;  %v68_v41 = vld [vmem:[#allocation2 + $0xe0] sm:$0xff]  ;;  %v53_v42 = vld [vmem:[#allocation2 + $0x68] sm:$0xff]  ;;  %v54_v44 = vld [vmem:[#allocation2 + $0x70] sm:$0xff] }
  0x2b   :  { %457 = vmatprep.subr.mxu0 %v80_v7  ;;  %530 = vmatprep.subr.mxu1 %v80_v7  ;;  %v69_v43 = vld [vmem:[#allocation2 + $0xe8] sm:$0xff]  ;;  %v70_v45 = vld [vmem:[#allocation2 + $0xf0] sm:$0xff]  ;;  %v55_v46 = vld [vmem:[#allocation2 + $0x78] sm:$0xff] }
  0x2c   :  { %458 = vmatpush3.msra.mxu0 %v80_v7  ;;  %546 = vmatpush3.msra.mxu1 %v80_v7  ;;  %v71_v47 = vld [vmem:[#allocation2 + $0xf8] sm:$0xff] }
  0x2d   :  { %459 = vmatprep.subr.mxu0 %v79_v8  ;;  %531 = vmatprep.subr.mxu1 %v79_v8 }
  0x2e   :  { %460 = vmatpush3.msra.mxu0 %v79_v8  ;;  %547 = vmatpush3.msra.mxu1 %v79_v8 }
  0x2f   :  { %461 = vmatprep.subr.mxu0 %v78_v9  ;;  %532 = vmatprep.subr.mxu1 %v78_v9 }
  0x30   :  { %462 = vmatpush3.msra.mxu0 %v78_v9  ;;  %548 = vmatpush3.msra.mxu1 %v78_v9 }
  0x31   :  { %463 = vmatprep.subr.mxu0 %v77_v10  ;;  %533 = vmatprep.subr.mxu1 %v77_v10 }
  0x32   :  { %464 = vmatpush3.msra.mxu0 %v77_v10  ;;  %549 = vmatpush3.msra.mxu1 %v77_v10 }
  0x33   :  { %465 = vmatprep.subr.mxu0 %v76_v11  ;;  %534 = vmatprep.subr.mxu1 %v76_v11 }
  0x34   :  { %466 = vmatpush3.msra.mxu0 %v76_v11  ;;  %550 = vmatpush3.msra.mxu1 %v76_v11 }
  0x35   :  { %467 = vmatprep.subr.mxu0 %v75_v12  ;;  %535 = vmatprep.subr.mxu1 %v75_v12 }
  0x36   :  { %468 = vmatpush3.msra.mxu0 %v75_v12  ;;  %551 = vmatpush3.msra.mxu1 %v75_v12 }
  0x37   :  { %469 = vmatprep.subr.mxu0 %v74_v13  ;;  %536 = vmatprep.subr.mxu1 %v74_v13 }
  0x38   :  { %470 = vmatpush3.msra.mxu0 %v74_v13  ;;  %552 = vmatpush3.msra.mxu1 %v74_v13 }
  0x39   :  { %471 = vmatprep.subr.mxu0 %v73_v14  ;;  %537 = vmatprep.subr.mxu1 %v73_v14 }
  0x3a   :  { %472 = vmatpush3.msra.mxu0 %v73_v14  ;;  %553 = vmatpush3.msra.mxu1 %v73_v14 }
  0x3b   :  { %473 = vmatprep.subr.mxu0 %v72_v15  ;;  %538 = vmatprep.subr.mxu1 %v72_v15 }
  0x3c   :  { %474 = vmatpush3.msra.mxu0 %v72_v15  ;;  %554 = vmatpush3.msra.mxu1 %v72_v15 }
  0x3d   :  { %475 = vmatprep.mubr.f32.mxu0 %v40_v16  ;;  %499 = vmatprep.mubr.f32.mxu1 %v56_v17 }
  0x3e   :  { %476 = vmatmul.mubr.f32.vlgmr.msra.gmra.mxu0 %v41_v18  ;;  %500 = vmatmul.mubr.f32.vlgmr.msra.gmra.mxu1 %v57_v19 }
  0x3f   :  { %478 = vmatprep.mubr.f32.mxu0 %v42_v20  ;;  %502 = vmatprep.mubr.f32.mxu1 %v58_v21 }
  0x42   :  { %479 = vmatmul.mubr.f32.gmra.mxu0 %v43_v22  ;;  %503 = vmatmul.mubr.f32.gmra.mxu1 %v59_v23 }
  0x43   :  { %481 = vmatprep.mubr.f32.mxu0 %v44_v24  ;;  %505 = vmatprep.mubr.f32.mxu1 %v60_v25 }
  0x46   :  { %482 = vmatmul.mubr.f32.gmra.mxu0 %v45_v26  ;;  %506 = vmatmul.mubr.f32.gmra.mxu1 %v61_v27 }
  0x47   :  { %484 = vmatprep.mubr.f32.mxu0 %v46_v28  ;;  %508 = vmatprep.mubr.f32.mxu1 %v62_v29 }
  0x4a   :  { %485 = vmatmul.mubr.f32.gmra.mxu0 %v47_v30  ;;  %509 = vmatmul.mubr.f32.gmra.mxu1 %v63_v31 }
  0x4b   :  { %487 = vmatprep.mubr.f32.mxu0 %v48_v32  ;;  %511 = vmatprep.mubr.f32.mxu1 %v64_v33 }
  0x4e   :  { %488 = vmatmul.mubr.f32.gmra.mxu0 %v49_v34  ;;  %512 = vmatmul.mubr.f32.gmra.mxu1 %v65_v35 }
  0x4f   :  { %490 = vmatprep.mubr.f32.mxu0 %v50_v36  ;;  %514 = vmatprep.mubr.f32.mxu1 %v66_v37 }
  0x52   :  { %491 = vmatmul.mubr.f32.gmra.mxu0 %v51_v38  ;;  %515 = vmatmul.mubr.f32.gmra.mxu1 %v67_v39 }
  0x53   :  { %493 = vmatprep.mubr.f32.mxu0 %v52_v40  ;;  %517 = vmatprep.mubr.f32.mxu1 %v68_v41 }
  0x56   :  { %494 = vmatmul.mubr.f32.gmra.mxu0 %v53_v42  ;;  %518 = vmatmul.mubr.f32.gmra.mxu1 %v69_v43 }
  0x57   :  { %496 = vmatprep.mubr.f32.mxu0 %v54_v44  ;;  %520 = vmatprep.mubr.f32.mxu1 %v70_v45 }
  0x5a   :  { %497 = vmatmul.mubr.f32.gmra.mxu0 %v55_v46  ;;  %521 = vmatmul.mubr.f32.gmra.mxu1 %v71_v47 }
  0xfe   :  { %v477_v48 = vpop.f32.mrf.mxu0  ;;  %v501_v49 = vpop.f32.mrf.mxu1 }
  0xff   :  { %v314_v50 = vmax.f32 %v477_v48, 0.0  ;;  %v330_v51 = vmax.f32 %v501_v49, 0.0 }
 0x100   :  { %v154_v52 = vpop.f32.mrf.mxu0  ;;  %v234_v53 = vpop.f32.mrf.mxu1 }
 0x101   :  { %346 = vst [vmem:[#allocation7 + $0x8] sm:$0xff] %v314_v50  ;;  %362 = vst [vmem:[#allocation7 + $0x88] sm:$0xff] %v330_v51  ;;  %v313_v54 = vmax.f32 %v154_v52, 0.0  ;;  %v329_v55 = vmax.f32 %v234_v53, 0.0 }
 0x102   :  { %v480_v56 = vpop.f32.mrf.mxu0  ;;  %v504_v57 = vpop.f32.mrf.mxu1 }
 0x103   :  { %345 = vst [vmem:[#allocation7] sm:$0xff] %v313_v54  ;;  %361 = vst [vmem:[#allocation7 + $0x80] sm:$0xff] %v329_v55  ;;  %v316_v58 = vmax.f32 %v480_v56, 0.0  ;;  %v332_v59 = vmax.f32 %v504_v57, 0.0 }
 0x104   :  { %v164_v60 = vpop.f32.mrf.mxu0  ;;  %v244_v61 = vpop.f32.mrf.mxu1 }
 0x105   :  { %348 = vst [vmem:[#allocation7 + $0x18] sm:$0xff] %v316_v58  ;;  %364 = vst [vmem:[#allocation7 + $0x98] sm:$0xff] %v332_v59  ;;  %v315_v62 = vmax.f32 %v164_v60, 0.0  ;;  %v331_v63 = vmax.f32 %v244_v61, 0.0 }
 0x106   :  { %v483_v0 = vpop.f32.mrf.mxu0  ;;  %v507_v1 = vpop.f32.mrf.mxu1 }
 0x107   :  { %347 = vst [vmem:[#allocation7 + $0x10] sm:$0xff] %v315_v62  ;;  %363 = vst [vmem:[#allocation7 + $0x90] sm:$0xff] %v331_v63  ;;  %v318_v2 = vmax.f32 %v483_v0, 0.0  ;;  %v334_v3 = vmax.f32 %v507_v1, 0.0 }
 0x108   :  { %v174_v4 = vpop.f32.mrf.mxu0  ;;  %v254_v5 = vpop.f32.mrf.mxu1 }
 0x109   :  { %350 = vst [vmem:[#allocation7 + $0x28] sm:$0xff] %v318_v2  ;;  %366 = vst [vmem:[#allocation7 + $0xa8] sm:$0xff] %v334_v3  ;;  %v317_v6 = vmax.f32 %v174_v4, 0.0  ;;  %v333_v7 = vmax.f32 %v254_v5, 0.0 }
 0x10a   :  { %v486_v8 = vpop.f32.mrf.mxu0  ;;  %v510_v9 = vpop.f32.mrf.mxu1 }
 0x10b   :  { %349 = vst [vmem:[#allocation7 + $0x20] sm:$0xff] %v317_v6  ;;  %365 = vst [vmem:[#allocation7 + $0xa0] sm:$0xff] %v333_v7  ;;  %v320_v10 = vmax.f32 %v486_v8, 0.0  ;;  %v336_v11 = vmax.f32 %v510_v9, 0.0 }
 0x10c   :  { %v184_v12 = vpop.f32.mrf.mxu0  ;;  %v264_v13 = vpop.f32.mrf.mxu1 }
 0x10d   :  { %352 = vst [vmem:[#allocation7 + $0x38] sm:$0xff] %v320_v10  ;;  %368 = vst [vmem:[#allocation7 + $0xb8] sm:$0xff] %v336_v11  ;;  %v319_v14 = vmax.f32 %v184_v12, 0.0  ;;  %v335_v15 = vmax.f32 %v264_v13, 0.0 }
 0x10e   :  { %v489_v16 = vpop.f32.mrf.mxu0  ;;  %v513_v17 = vpop.f32.mrf.mxu1 }
 0x10f   :  { %351 = vst [vmem:[#allocation7 + $0x30] sm:$0xff] %v319_v14  ;;  %367 = vst [vmem:[#allocation7 + $0xb0] sm:$0xff] %v335_v15  ;;  %v322_v18 = vmax.f32 %v489_v16, 0.0  ;;  %v338_v19 = vmax.f32 %v513_v17, 0.0 }
 0x110   :  { %v194_v20 = vpop.f32.mrf.mxu0  ;;  %v274_v21 = vpop.f32.mrf.mxu1 }
 0x111   :  { %354 = vst [vmem:[#allocation7 + $0x48] sm:$0xff] %v322_v18  ;;  %370 = vst [vmem:[#allocation7 + $0xc8] sm:$0xff] %v338_v19  ;;  %v321_v22 = vmax.f32 %v194_v20, 0.0  ;;  %v337_v23 = vmax.f32 %v274_v21, 0.0 }
 0x112   :  { %v492_v24 = vpop.f32.mrf.mxu0  ;;  %v516_v25 = vpop.f32.mrf.mxu1 }
 0x113   :  { %353 = vst [vmem:[#allocation7 + $0x40] sm:$0xff] %v321_v22  ;;  %369 = vst [vmem:[#allocation7 + $0xc0] sm:$0xff] %v337_v23  ;;  %v324_v26 = vmax.f32 %v492_v24, 0.0  ;;  %v340_v27 = vmax.f32 %v516_v25, 0.0 }
 0x114   :  { %v204_v28 = vpop.f32.mrf.mxu0  ;;  %v284_v29 = vpop.f32.mrf.mxu1 }
 0x115   :  { %356 = vst [vmem:[#allocation7 + $0x58] sm:$0xff] %v324_v26  ;;  %372 = vst [vmem:[#allocation7 + $0xd8] sm:$0xff] %v340_v27  ;;  %v323_v30 = vmax.f32 %v204_v28, 0.0  ;;  %v339_v31 = vmax.f32 %v284_v29, 0.0 }
 0x116   :  { %v495_v32 = vpop.f32.mrf.mxu0  ;;  %v519_v33 = vpop.f32.mrf.mxu1 }
 0x117   :  { %355 = vst [vmem:[#allocation7 + $0x50] sm:$0xff] %v323_v30  ;;  %371 = vst [vmem:[#allocation7 + $0xd0] sm:$0xff] %v339_v31  ;;  %v326_v34 = vmax.f32 %v495_v32, 0.0  ;;  %v342_v35 = vmax.f32 %v519_v33, 0.0 }
 0x118   :  { %v214_v36 = vpop.f32.mrf.mxu0  ;;  %v294_v37 = vpop.f32.mrf.mxu1 }
 0x119   :  { %358 = vst [vmem:[#allocation7 + $0x68] sm:$0xff] %v326_v34  ;;  %374 = vst [vmem:[#allocation7 + $0xe8] sm:$0xff] %v342_v35  ;;  %v325_v38 = vmax.f32 %v214_v36, 0.0  ;;  %v341_v39 = vmax.f32 %v294_v37, 0.0 }
 0x11a   :  { %v498_v40 = vpop.f32.mrf.mxu0  ;;  %v522_v41 = vpop.f32.mrf.mxu1 }
 0x11b   :  { %357 = vst [vmem:[#allocation7 + $0x60] sm:$0xff] %v325_v38  ;;  %373 = vst [vmem:[#allocation7 + $0xe0] sm:$0xff] %v341_v39  ;;  %v328_v42 = vmax.f32 %v498_v40, 0.0  ;;  %v344_v43 = vmax.f32 %v522_v41, 0.0 }
 0x11c   :  { %v224_v44 = vpop.f32.mrf.mxu0  ;;  %v304_v45 = vpop.f32.mrf.mxu1 }
 0x11d   :  { %360 = vst [vmem:[#allocation7 + $0x78] sm:$0xff] %v328_v42  ;;  %376 = vst [vmem:[#allocation7 + $0xf8] sm:$0xff] %v344_v43  ;;  %v327_v46 = vmax.f32 %v224_v44, 0.0  ;;  %v343_v47 = vmax.f32 %v304_v45, 0.0 }
 0x11f   :  { %359 = vst [vmem:[#allocation7 + $0x70] sm:$0xff] %v327_v46  ;;  %375 = vst [vmem:[#allocation7 + $0xf0] sm:$0xff] %v343_v47 }
 0x120   :  { %611 = shalt.err (!%p608_p0)
}
 0x121   :  { %388 = dma.vmem_to_hbm [thread:$0]  %s383_s1, 4096, %s666_s2, [#allocation4], %s627_s12, %s627_s12, %s628_s13  }
 0x122   :  { %624 = dma.done.wait [#allocation4], 4096  }
 0x123   :  { %625 = vsyncadd [#allocation4], 4294963200 }
 0x124   :  { %392 = vsyncpa [#allocation3], 1 }
 0x125   :  { %393 = vsyncpa [#allocation6], 1 }
 0x126   :  { %394 = vsyncpa [#allocation4], 1 }

</bundles_post_ra>
